<compile_context>
chip_gen: v6e
topology: v6e:2x2x1
jax: 0.10.0
libtpu: 0.0.40
codegen_flags: <defaults>
</compile_context>

<pallas_src>
import functools

import jax
import jax.numpy as jnp
from jax.experimental import pallas as pl
from jax.experimental.pallas import tpu as pltpu


def _round_up(x, m):
    return ((x + m - 1) // m) * m


def _contrastive_kernel(dcol_ref, drow_ref, im_ref, s_ref, out_ref, *, n_valid):
    i = pl.program_id(0)
    j = pl.program_id(1)
    gi = pl.num_programs(0)
    gj = pl.num_programs(1)

    # (bm, bn) similarity block on the MXU: contract the last (lane) dim of
    # both operands; f32 accumulation only (native-dtype inputs, no transpose).
    scores = jax.lax.dot_general(
        im_ref[...], s_ref[...], (((1,), (1,)), ((), ())),
        preferred_element_type=jnp.float32)
    bm, bn = scores.shape

    # Margin is pre-folded into the diag vectors in the wrapper
    # (d = diag - margin), so each hinge is just max(scores - d, 0).
    cost = (jnp.maximum(scores - dcol_ref[...], 0.0) +
            jnp.maximum(scores - drow_ref[...], 0.0))

    @pl.when(j == 0)
    def _():
        out_ref[...] = jnp.zeros_like(out_ref)

    # Diagonal entries live only in i == j blocks (square tiles); padded
    # rows/cols live only in the last row/col block.  Interior blocks take a
    # mask-free fast path.
    need_mask = jnp.logical_or(i == j,
                               jnp.logical_or(i == gi - 1, j == gj - 1))

    @pl.when(need_mask)
    def _():
        row_v = i * bm + jax.lax.broadcasted_iota(jnp.int32, (bm, 1), 0)
        col_v = j * bn + jax.lax.broadcasted_iota(jnp.int32, (1, bn), 1)
        keep = (row_v != col_v) & (row_v < n_valid) & (col_v < n_valid)
        masked = jnp.where(keep, cost, 0.0)
        psum = jnp.sum(masked, axis=0, keepdims=True)          # (1, bn)
        out_ref[...] += psum[None]                             # (1, 1, bn)

    @pl.when(jnp.logical_not(need_mask))
    def _():
        psum = jnp.sum(cost, axis=0, keepdims=True)            # (1, bn)
        out_ref[...] += psum[None]                             # (1, 1, bn)


def _pick_block(n, dp, itemsize):
    # 256 tiles fill the 2x256^2 MXU on v6e/v7x (and keep gi >= 2 since
    # n >= 512 there); 128 already fills v5e's 4x128^2 MXU.
    bm = 256 if n >= 512 else 128
    bm = min(bm, _round_up(n, 8))
    # VMEM budget guard: keep the double-buffered streamed input footprint
    # comfortably inside v7x's 64 MiB physical VMEM.
    while bm > 8 and 2 * 2 * bm * dp * itemsize > (16 << 20):
        bm = max(8, ((bm // 2) + 7) // 8 * 8)
    return bm


def contrastive_loss(im, s, margin=0.0, *, block=None, small_fallback=False):
    """im: (N, D), s: (N, D) -> scalar loss (float32). margin is static."""
    n, d = im.shape
    assert s.shape == (n, d)

    dp = _round_up(d, 128)                 # lane-aligned contracting dim
    bm = block if block is not None else _pick_block(n, dp, im.dtype.itemsize)
    bm = min(bm, _round_up(n, 8))
    assert bm % 8 == 0
    n_pad = _round_up(n, bm)
    gi = n_pad // bm
    gj = n_pad // bm

    if small_fallback and gi == 1:
        # Single grid step: launch/DMA overhead dominates; a fused XLA
        # matmul+reduce is at least as fast.
        return _reference(im, s, margin)

    # diag[k] = im[k] . s[k], computed once here instead of per grid step;
    # margin folded in.  Padded entries are masked out in the kernel.
    diag = jnp.sum(im.astype(jnp.float32) * s.astype(jnp.float32), axis=-1)
    diag = jnp.pad(diag - jnp.float32(margin), (0, n_pad - n))
    dcol = diag.reshape(n_pad, 1)
    drow = diag.reshape(1, n_pad)

    def pad2(x):
        return jnp.pad(x, ((0, n_pad - n), (0, dp - d)))

    im_p = pad2(im)
    s_p = pad2(s)

    kernel = functools.partial(_contrastive_kernel, n_valid=n)

    # Explicit VMEM budget: double-buffered streamed blocks + diag + output
    # tiles + epilogue temporaries, 2x headroom, clamped under v7x's 64 MiB.
    bytes_stream = 2 * 2 * bm * dp * im_p.dtype.itemsize    # im row + s col
    bytes_small = 2 * (bm * 128 + 2 * 8 * bm) * 4           # diag blocks + out
    bytes_tmp = 4 * bm * bm * 4                             # scores/cost/mask
    vmem_limit = int(min(max(2 * (bytes_stream + bytes_small + bytes_tmp),
                             32 << 20), 56 << 20))

    out = pl.pallas_call(
        kernel,
        out_shape=jax.ShapeDtypeStruct((gi, 1, bm), jnp.float32),
        grid_spec=pltpu.PrefetchScalarGridSpec(
            num_scalar_prefetch=0,
            grid=(gi, gj),
            in_specs=[
                pl.BlockSpec((bm, 1), lambda i, j: (i, 0)),   # diag-margin (rows)
                pl.BlockSpec((1, bm), lambda i, j: (0, j)),   # diag-margin (cols)
                pl.BlockSpec((bm, dp), lambda i, j: (i, 0)),  # im rows (resident over j)
                pl.BlockSpec((bm, dp), lambda i, j: (j, 0)),  # s cols (streamed over j)
            ],
            out_specs=pl.BlockSpec((1, 1, bm), lambda i, j: (i, 0, 0)),
        ),
        compiler_params=pltpu.CompilerParams(
            dimension_semantics=("parallel", "arbitrary"),
            vmem_limit_bytes=vmem_limit),
    )(dcol, drow, im_p, s_p)

    return jnp.sum(out)


def _reference(im, s, margin=0.0):
    im = im.astype(jnp.float32)
    s = s.astype(jnp.float32)
    scores = im @ s.T
    diag = jnp.diag(scores)
    cost_s = jnp.maximum(margin + scores - diag[:, None], 0.0)
    cost_im = jnp.maximum(margin + scores - diag[None, :], 0.0)
    eye = jnp.eye(scores.shape[0], dtype=bool)
    cost_s = jnp.where(eye, 0.0, cost_s)
    cost_im = jnp.where(eye, 0.0, cost_im)
    return jnp.sum(cost_s) + jnp.sum(cost_im)


if __name__ == "__main__":
    key = jax.random.PRNGKey(0)

    def check(n, d, margin, rtol, atol, key):
        k_im, k_s, key = jax.random.split(key, 3)
        im = jax.random.normal(k_im, (n, d), dtype=jnp.float32).astype(jnp.bfloat16)
        s = jax.random.normal(k_s, (n, d), dtype=jnp.float32).astype(jnp.bfloat16)
        loss = jax.block_until_ready(contrastive_loss(im, s, margin=margin))
        ref = _reference(im, s, margin=margin)
        assert jnp.allclose(loss, ref, rtol=rtol, atol=atol), (n, d, loss, ref)
        return key

    # Case 1: toy shape implied by the original module (single grid step,
    # masked epilogue path).
    key = check(8, 32, 0.2, 1e-3, 1e-2, key)

    # Case 2: tiled grid with padded rows/cols (boundary-mask path) and
    # revisit-accumulation over the column axis.
    key = check(144, 40, 0.1, 2e-3, 1e-1, key)

    # Case 3: grid large enough (3x3) to exercise the mask-free interior path.
    key = check(384, 128, 0.2, 3e-3, 1.0, key)

    # Optional small-problem dispatch: single-grid-step inputs fall back to a
    # fused XLA matmul+reduce when explicitly allowed.
    k_im, k_s, key = jax.random.split(key, 3)
    im_t = jax.random.normal(k_im, (8, 32), dtype=jnp.float32).astype(jnp.bfloat16)
    s_t = jax.random.normal(k_s, (8, 32), dtype=jnp.float32).astype(jnp.bfloat16)
    fb = jax.block_until_ready(
        contrastive_loss(im_t, s_t, margin=0.2, small_fallback=True))
    assert jnp.allclose(fb, _reference(im_t, s_t, 0.2), rtol=1e-5, atol=1e-5)

    print("KERNEL_OK")
</pallas_src>

<mosaic_0001>
module attributes {stable_mosaic.version = 11 : i64} {
  func.func @_contrastive_kernel(%arg0: i32, %arg1: i32, %arg2: memref<8x1xf32, #tpu.memory_space<vmem>>, %arg3: memref<1x8xf32, #tpu.memory_space<vmem>>, %arg4: memref<8x128xbf16, #tpu.memory_space<vmem>>, %arg5: memref<8x128xbf16, #tpu.memory_space<vmem>>, %arg6: memref<1x1x8xf32, #tpu.memory_space<vmem>>) attributes {dimension_semantics = [#tpu.dimension_semantics<parallel>, #tpu.dimension_semantics<arbitrary>], iteration_bounds = array<i64: 1, 1>, scalar_prefetch = 0 : i64, scratch_operands = 0 : i64, tpu.core_type = #tpu.core_type<tc>, window_params = [{transform_indices = @transform_0, window_bounds = array<i64: 8, 1>}, {transform_indices = @transform_1, window_bounds = array<i64: 1, 8>}, {transform_indices = @transform_2, window_bounds = array<i64: 8, 128>}, {transform_indices = @transform_3, window_bounds = array<i64: 8, 128>}, {transform_indices = @transform_4, window_bounds = array<i64: 1, 1, 8>}]} {
    %c0 = arith.constant 0 : index
    %c0_0 = arith.constant 0 : index
    %0 = vector.load %arg4[%c0, %c0_0] : memref<8x128xbf16, #tpu.memory_space<vmem>>, vector<8x128xbf16>
    %c0_1 = arith.constant 0 : index
    %c0_2 = arith.constant 0 : index
    %1 = vector.load %arg5[%c0_1, %c0_2] : memref<8x128xbf16, #tpu.memory_space<vmem>>, vector<8x128xbf16>
    %cst = arith.constant dense<0.000000e+00> : vector<8x8xf32>
    %2 = tpu.matmul %0, %1, %cst {dimension_numbers = #tpu.dot_dimension_numbers<[1], [1], [0], [0], [0, 0, 1, 0], [], []>} : vector<8x128xbf16>, vector<8x128xbf16>, vector<8x8xf32> -> vector<8x8xf32>
    %c0_3 = arith.constant 0 : index
    %c0_4 = arith.constant 0 : index
    %3 = vector.load %arg2[%c0_3, %c0_4] : memref<8x1xf32, #tpu.memory_space<vmem>>, vector<8x1xf32>
    %4 = vector.broadcast %3 : vector<8x1xf32> to vector<8x8xf32>
    %5 = arith.subf %2, %4 : vector<8x8xf32>
    %cst_5 = arith.constant 0.000000e+00 : f32
    %6 = vector.broadcast %cst_5 : f32 to vector<8x8xf32>
    %7 = arith.maximumf %5, %6 : vector<8x8xf32>
    %c0_6 = arith.constant 0 : index
    %c0_7 = arith.constant 0 : index
    %8 = vector.load %arg3[%c0_6, %c0_7] : memref<1x8xf32, #tpu.memory_space<vmem>>, vector<1x8xf32>
    %9 = vector.broadcast %8 : vector<1x8xf32> to vector<8x8xf32>
    %10 = arith.subf %2, %9 : vector<8x8xf32>
    %cst_8 = arith.constant 0.000000e+00 : f32
    %11 = vector.broadcast %cst_8 : f32 to vector<8x8xf32>
    %12 = arith.maximumf %10, %11 : vector<8x8xf32>
    %13 = arith.addf %7, %12 : vector<8x8xf32>
    %c0_i32 = arith.constant 0 : i32
    %14 = arith.cmpi eq, %arg1, %c0_i32 : i32
    %15 = arith.extui %14 : i1 to i32
    %c0_i32_9 = arith.constant 0 : i32
    %16 = arith.cmpi ne, %15, %c0_i32_9 : i32
    scf.if %16 {
      %cst_14 = arith.constant 0.000000e+00 : f32
      %27 = vector.broadcast %cst_14 : f32 to vector<1x1x8xf32>
      %c0_15 = arith.constant 0 : index
      %c0_16 = arith.constant 0 : index
      %c0_17 = arith.constant 0 : index
      %28 = vector.load %arg6[%c0_15, %c0_16, %c0_17] : memref<1x1x8xf32, #tpu.memory_space<vmem>>, vector<1x1x8xf32>
      tpu.vector_store %arg6[%c0_15, %c0_16, %c0_17], %27 {strides = array<i32>} : memref<1x1x8xf32, #tpu.memory_space<vmem>>, vector<1x1x8xf32>,
    } else {
    }
    %17 = arith.cmpi eq, %arg0, %arg1 : i32
    %c0_i32_10 = arith.constant 0 : i32
    %18 = arith.cmpi eq, %arg0, %c0_i32_10 : i32
    %c0_i32_11 = arith.constant 0 : i32
    %19 = arith.cmpi eq, %arg1, %c0_i32_11 : i32
    %20 = arith.ori %18, %19 : i1
    %21 = arith.ori %17, %20 : i1
    %22 = arith.extui %21 : i1 to i32
    %c0_i32_12 = arith.constant 0 : i32
    %23 = arith.cmpi ne, %22, %c0_i32_12 : i32
    scf.if %23 {
      %c8_i32 = arith.constant 8 : i32
      %27 = arith.muli %arg0, %c8_i32 : i32
      %28 = tpu.iota {dimensions = array<i32: 0>} : vector<8x1xi32>
      %29 = vector.broadcast %27 : i32 to vector<8x1xi32>
      %30 = arith.addi %29, %28 : vector<8x1xi32>
      %c8_i32_14 = arith.constant 8 : i32
      %31 = arith.muli %arg1, %c8_i32_14 : i32
      %32 = tpu.iota {dimensions = array<i32: 1>} : vector<1x8xi32>
      %33 = vector.broadcast %31 : i32 to vector<1x8xi32>
      %34 = arith.addi %33, %32 : vector<1x8xi32>
      %35 = vector.broadcast %30 : vector<8x1xi32> to vector<8x8xi32>
      %36 = vector.broadcast %34 : vector<1x8xi32> to vector<8x8xi32>
      %37 = arith.cmpi ne, %35, %36 : vector<8x8xi32>
      %c8_i32_15 = arith.constant 8 : i32
      %38 = vector.broadcast %c8_i32_15 : i32 to vector<8x1xi32>
      %39 = arith.cmpi slt, %30, %38 : vector<8x1xi32>
      %40 = vector.broadcast %39 : vector<8x1xi1> to vector<8x8xi1>
      %41 = arith.andi %37, %40 : vector<8x8xi1>
      %c8_i32_16 = arith.constant 8 : i32
      %42 = vector.broadcast %c8_i32_16 : i32 to vector<1x8xi32>
      %43 = arith.cmpi slt, %34, %42 : vector<1x8xi32>
      %44 = vector.broadcast %43 : vector<1x8xi1> to vector<8x8xi1>
      %45 = arith.andi %41, %44 : vector<8x8xi1>
      %cst_17 = arith.constant 0.000000e+00 : f32
      %46 = vector.broadcast %cst_17 : f32 to vector<8x8xf32>
      %47 = arith.select %45, %13, %46 : vector<8x8xi1>, vector<8x8xf32>
      %cst_18 = arith.constant dense<0.000000e+00> : vector<8xf32>
      %48 = vector.multi_reduction <add>, %47, %cst_18 [0] : vector<8x8xf32> to vector<8xf32>
      %49 = vector.shape_cast %48 : vector<8xf32> to vector<1x8xf32>
      %c0_19 = arith.constant 0 : index
      %c0_20 = arith.constant 0 : index
      %c0_21 = arith.constant 0 : index
      %50 = vector.load %arg6[%c0_19, %c0_20, %c0_21] : memref<1x1x8xf32, #tpu.memory_space<vmem>>, vector<1x1x8xf32>
      %51 = vector.shape_cast %49 : vector<1x8xf32> to vector<1x1x8xf32>
      %52 = arith.addf %50, %51 : vector<1x1x8xf32>
      %c0_22 = arith.constant 0 : index
      %c0_23 = arith.constant 0 : index
      %c0_24 = arith.constant 0 : index
      %53 = vector.load %arg6[%c0_22, %c0_23, %c0_24] : memref<1x1x8xf32, #tpu.memory_space<vmem>>, vector<1x1x8xf32>
      tpu.vector_store %arg6[%c0_22, %c0_23, %c0_24], %52 {strides = array<i32>} : memref<1x1x8xf32, #tpu.memory_space<vmem>>, vector<1x1x8xf32>,
    } else {
    }
    %true = arith.constant true
    %24 = arith.xori %21, %true : i1
    %25 = arith.extui %24 : i1 to i32
    %c0_i32_13 = arith.constant 0 : i32
    %26 = arith.cmpi ne, %25, %c0_i32_13 : i32
    scf.if %26 {
      %cst_14 = arith.constant dense<0.000000e+00> : vector<8xf32>
      %27 = vector.multi_reduction <add>, %13, %cst_14 [0] : vector<8x8xf32> to vector<8xf32>
      %28 = vector.shape_cast %27 : vector<8xf32> to vector<1x8xf32>
      %c0_15 = arith.constant 0 : index
      %c0_16 = arith.constant 0 : index
      %c0_17 = arith.constant 0 : index
      %29 = vector.load %arg6[%c0_15, %c0_16, %c0_17] : memref<1x1x8xf32, #tpu.memory_space<vmem>>, vector<1x1x8xf32>
      %30 = vector.shape_cast %28 : vector<1x8xf32> to vector<1x1x8xf32>
      %31 = arith.addf %29, %30 : vector<1x1x8xf32>
      %c0_18 = arith.constant 0 : index
      %c0_19 = arith.constant 0 : index
      %c0_20 = arith.constant 0 : index
      %32 = vector.load %arg6[%c0_18, %c0_19, %c0_20] : memref<1x1x8xf32, #tpu.memory_space<vmem>>, vector<1x1x8xf32>
      tpu.vector_store %arg6[%c0_18, %c0_19, %c0_20], %31 {strides = array<i32>} : memref<1x1x8xf32, #tpu.memory_space<vmem>>, vector<1x1x8xf32>,
    } else {
    }
    return
  }
  func.func @transform_0(%arg0: i32, %arg1: i32) -> (i32, i32) {
    %c0_i32 = arith.constant 0 : i32
    %c0_i32_0 = arith.constant 0 : i32
    return %arg0, %c0_i32 : i32, i32
  }
  func.func @transform_1(%arg0: i32, %arg1: i32) -> (i32, i32) {
    %c0_i32 = arith.constant 0 : i32
    %c0_i32_0 = arith.constant 0 : i32
    return %c0_i32, %arg1 : i32, i32
  }
  func.func @transform_2(%arg0: i32, %arg1: i32) -> (i32, i32) {
    %c0_i32 = arith.constant 0 : i32
    %c0_i32_0 = arith.constant 0 : i32
    return %arg0, %c0_i32 : i32, i32
  }
  func.func @transform_3(%arg0: i32, %arg1: i32) -> (i32, i32) {
    %c0_i32 = arith.constant 0 : i32
    %c0_i32_0 = arith.constant 0 : i32
    return %arg1, %c0_i32 : i32, i32
  }
  func.func @transform_4(%arg0: i32, %arg1: i32) -> (i32, i32, i32) {
    %c0_i32 = arith.constant 0 : i32
    %c0_i32_0 = arith.constant 0 : i32
    %c0_i32_1 = arith.constant 0 : i32
    return %arg0, %c0_i32, %c0_i32_0 : i32, i32, i32
  }
}

</mosaic_0001>

<bundles_post_ra>
// kernel: tpu_custom_call.1
= control target key start
LH: loop header
LB: loop body
LE: loop exit
PB: predicated region body
PF: predicated region fallthrough
CT: control target
= control target key end

     0   :  { %vm83_vm0 = vcmask 57344   ;;  %v189_v1 = vmov 0.0   ;;  %vm190_vm1 = vmmov 0   ;;  %s235_s0 = inlined_call_operand.vmem [shape: f32[8,1], index: 0, kind: input, shape index: {}]   ;;  %s236_s1 = inlined_call_operand.vmem [shape: f32[1,8], index: 1, kind: input, shape index: {}]   ;;  %s237_s2 = inlined_call_operand.vmem [shape: bf16[8,128], index: 2, kind: input, shape index: {}]   ;;  %s238_s3 = inlined_call_operand.vmem [shape: bf16[8,128], index: 3, kind: input, shape index: {}]   ;;  %s239_s4 = inlined_call_operand.hbm [shape: f32[1,1,8], index: 4, kind: output, shape index: {}]  }
   0x1   :  { %v20_v0 = vld [vmem:[%s238_s3] sm:$0xf]  ;;  %156 = vmatprep.subr.bf16.mxu0 %v189_v1  ;;  %84 = vst.msk [vmem:[#allocation2] sm:$0x1] %vm83_vm0, %v189_v1  ;;  %158 = vmatprep.mubr.msk.bf16.mxu0 %vm190_vm1, %v189_v1 }
   0x2   :  { %v61_v2 = vld [vmem:[%s235_s0] sm:$0xff] }
   0x3   :  { %9 = vsyncpa [#allocation3], 0  ;;  %157 = vmatpush3.bf16.xpose.msra.mxu0 %v20_v0  ;;  %v191_v3 = vmov 0   ;;  %v19_v4 = vld [vmem:[%s237_s2] sm:$0xf]  ;;  %v93_v5 = vlaneseq  ;;  %vm112_vm5 = vcmask 64512  }
   0x4   :  { %166 = vset.pattern.permute.xlu0 %v191_v3  ;;  %v153_v9 = vld [vmem:[%s236_s1] ss:$0 sm:$0xff]  ;;  %s192_s0 = smov [#allocation2]  }
   0x5   :  { %64 = vperm.xlu0 %166, %v61_v2   ;;  %v94_v6 = vshrl.u32 %v93_v5, 7  ;;  %v99_v7 = vand.u32 127, %v93_v5  ;;  %s145_s1 = sshll.u32 %s192_s0, 4  ;;  %s146_s1 = int_to_ptr.vmem [resolvable:$true] %s145_s1 }
   0x6   :  { %s167_s2 = scalar_lea.vmem %s146_s1, 16  ;;  %s171_s22 = scalar_lea.vmem %s146_s1, 32 }
   0x7   :  { %vm102_vm2 = vcmp.ne.s32.totalorder %v94_v6, %v99_v7  ;;  %vm107_vm3 = vcmp.lt.s32.totalorder %v99_v7, 8  ;;  %p168_p0 = scmp.ne.s32.totalorder %s146_s1, %s167_s2  ;;  %p172_p1 = scmp.lt.s32.totalorder %s146_s1, %s146_s1 }
   0x8   :  { %vm110_vm4 = vmand %vm102_vm2, %vm107_vm3  ;;  %v120_v26 = vld [vmem:[#allocation2] sm:$0x1]  ;;  %p173_p2 = scmp.lt.s32.totalorder %s171_s22, %s167_s2 }
   0xa   :  { %159 = vmatmul.mubr.bf16.vlgmr.msra.gmra.mxu0 %v19_v4  ;;  %p174_p3 = por %p173_p2, %p172_p1 }
   0xc   :  { %p175_p4 = pnand %p174_p3, %p168_p0 }
  0x80   :  { %v65_v8 = vpop.permute.xlu0 %64 }
  0xca   :  { %v55_v10 = vpop.f32.mrf.mxu0 }
  0xcb   :  { %v67_v11 = vsub.f32 %v55_v10, %v65_v8  ;;  %v76_v12 = vsub.f32 %v55_v10, %v153_v9 }
  0xcc   :  { %v160_v13 = vpop.f32.mrf.mxu0 }
  0xcd   :  { %v68_v14 = vmax.f32 %v67_v11, 0.0  ;;  %v77_v15 = vmax.f32 %v76_v12, 0.0 }
  0xce   :  { %v58_v16 = vpop.f32.mrf.mxu0 }
  0xcf   :  { %v78_v17 = vadd.f32 %v77_v15, %v68_v14 }
  0xd0   :  { %v161_v18 = vpop.f32.mrf.mxu0 }
  0xd1   :  { %v111_v19 = vsel %vm110_vm4, %v78_v17, 0.0 }
  0xd2   :  { %v113_v20 = vsel %vm112_vm5, %v111_v19, 0.0 }
  0xd3   :  { %v114_v21 = vrot.slane %v113_v20, 4 }
  0xd5   :  { %v115_v22 = vadd.f32 %v114_v21, %v113_v20 }
  0xd7   :  { %v116_v23 = vrot.slane %v115_v22, 2 }
  0xd9   :  { %v117_v24 = vadd.f32 %v116_v23, %v115_v22 }
  0xdb   :  { %v118_v25 = vrot.slane %v117_v24, 1 }
  0xdd   :  { %v119_v27 = vadd.f32 %v118_v25, %v117_v24 }
  0xdf   :  { %v121_v28 = vadd.f32 %v120_v26, %v119_v27 }
  0xe1   :  { %123 = vst.msk [vmem:[#allocation2] sm:$0x1] %vm83_vm0, %v121_v28 }
  0xe2   :  { %178 = shalt.err (!%p175_p4)
}
  0xe3   :  { %148 = dma.vmem_to_hbm [thread:$0]  %s146_s1, 16, %s239_s4, [#allocation3]  }
  0xe4   :  { %187 = dma.done.wait [#allocation3], 16  }
  0xe5   :  { %188 = vsyncadd [#allocation3], 4294967280 }
  0xe6   :  { %152 = vsyncpa [#allocation3], 1 }

</bundles_post_ra>
